<compile_context>
chip_gen: v7x
topology: tpu7x:2x2x1
jax: 0.10.0
libtpu: 0.0.40
codegen_flags: <defaults>
</compile_context>

<pallas_src>
import functools

import jax
import jax.numpy as jnp
import numpy as np
from jax.experimental import pallas as pl
from jax.experimental.pallas import tpu as pltpu


def _full_spec(shape):
    """Whole-array, VMEM-resident block (grid = ())."""
    return pl.BlockSpec(shape, lambda: (0,) * len(shape))


# -----------------------------------------------------------------------------
# Fused kernel.
#
# Ref layout (inputs, then outputs), L = num_layers, H = hidden_size:
#   0                 emb       (N, E)        bf16, layer-0 input
#   1                 h_in      (L, N, H)     f32
#   2                 c_in      (L, N, H)     f32
#   3 .. 3+L-1        w_ih_l    (D_l, 4H)     bf16, D_0 = E else H, cols [i,f,o,g]
#   3+L .. 3+2L-1     w_hh_l    (H, 4H)       bf16, cols [i,f,o,g]
#   3+2L .. 3+3L-1    bias_l    (1, 4H)       f32,  b_ih + b_hh, cols [i,f,o,g]
#   3+3L              w_fc      (H, O_pad)    bf16, zero-padded to 128-lane mult
#   3+3L+1            b_fc      (1, O_pad)    f32
#   outputs:
#     logits        (N, O_pad)   f32
#     state_packed  (N, 2*L*H)   f32   [h_0 .. h_{L-1} | c_0 .. c_{L-1}]
# -----------------------------------------------------------------------------
def _decoder_kernel(num_layers, hidden_size, *refs):
    L, H = num_layers, hidden_size
    emb_ref, h_in_ref, c_in_ref = refs[0], refs[1], refs[2]
    w_ih_refs = refs[3:3 + L]
    w_hh_refs = refs[3 + L:3 + 2 * L]
    b_refs = refs[3 + 2 * L:3 + 3 * L]
    w_fc_ref = refs[3 + 3 * L]
    b_fc_ref = refs[3 + 3 * L + 1]
    n_in = 3 + 3 * L + 2
    logits_ref, state_ref = refs[n_in], refs[n_in + 1]

    x = emb_ref[...]                                     # (N, D_0) bf16
    for l in range(L):                                   # unrolled at trace time
        h = h_in_ref[l]                                  # (N, H) f32
        c = c_in_ref[l]                                  # (N, H) f32

        # Two MXU dots (bf16 operands, f32 accumulate) + VPU add; no lane concat.
        gates = (
            jnp.dot(x.astype(jnp.bfloat16), w_ih_refs[l][...],
                    preferred_element_type=jnp.float32)
            + jnp.dot(h.astype(jnp.bfloat16), w_hh_refs[l][...],
                      preferred_element_type=jnp.float32)
            + b_refs[l][...]
        )                                                # (N, 4H) f32

        # Gate order [i, f, o, g]: sigmoid over the first 3H lanes only,
        # tanh over the last H lanes only.
        sig = jax.nn.sigmoid(gates[:, :3 * H])
        g_g = jnp.tanh(gates[:, 3 * H:])
        i_g = sig[:, 0 * H:1 * H]
        f_g = sig[:, 1 * H:2 * H]
        o_g = sig[:, 2 * H:3 * H]

        c_new = f_g * c + i_g * g_g
        h_new = o_g * jnp.tanh(c_new)

        # Lane-dense packed writeback: [h_0..h_{L-1} | c_0..c_{L-1}].
        state_ref[:, l * H:(l + 1) * H] = h_new
        state_ref[:, (L + l) * H:(L + l + 1) * H] = c_new
        x = h_new                    # inter-layer dropout == identity (eval)

    # Final projection, lane-dense (O padded to a multiple of 128).
    logits_ref[...] = (
        jnp.dot(x.astype(jnp.bfloat16), w_fc_ref[...],
                preferred_element_type=jnp.float32)
        + b_fc_ref[...]
    )


# -----------------------------------------------------------------------------
# Module wrapper
# -----------------------------------------------------------------------------
class DecoderLSTMPallas:
    def __init__(self, input_size, embedding_size, hidden_size, num_layers,
                 p, output_size, key):
        self.embedding_size = embedding_size
        self.hidden_size = hidden_size
        self.num_layers = num_layers
        self.output_size = output_size
        # p (dropout prob) unused: inference/eval dropout == identity.

        keys = jax.random.split(key, 1 + 4 * num_layers + 2)
        k = iter(keys)

        # Embedding table (input_size, embedding_size), f32.
        self.embedding = (jax.random.normal(
            next(k), (input_size, embedding_size)) * 0.1).astype(jnp.float32)

        # Row permutation: PyTorch gate order [i, f, g, o] -> kernel [i, f, o, g].
        H = hidden_size
        perm = np.concatenate([np.arange(0, H),            # i
                               np.arange(H, 2 * H),        # f
                               np.arange(3 * H, 4 * H),    # o
                               np.arange(2 * H, 3 * H)])   # g

        # Per-layer LSTM weights, transposed for right-multiplication and
        # stored bf16 for the MXU (f32 accumulate in-kernel).
        self.w_ih_t = []      # (D_l, 4H) bf16
        self.w_hh_t = []      # (H,   4H) bf16
        self.bias = []        # (1,   4H) f32  == b_ih + b_hh
        for layer in range(num_layers):
            in_dim = embedding_size if layer == 0 else hidden_size
            w_ih = jax.random.normal(next(k), (4 * H, in_dim)) * 0.1
            w_hh = jax.random.normal(next(k), (4 * H, H)) * 0.1
            b_ih = jax.random.normal(next(k), (4 * H,)) * 0.1
            b_hh = jax.random.normal(next(k), (4 * H,)) * 0.1
            self.w_ih_t.append(w_ih[perm].T.astype(jnp.bfloat16))
            self.w_hh_t.append(w_hh[perm].T.astype(jnp.bfloat16))
            self.bias.append(((b_ih + b_hh)[perm][None, :]).astype(jnp.float32))

        # Final Linear (output_size, hidden_size) + bias, zero-padded to a
        # lane-dense O_pad (multiple of 128).
        w_fc = jax.random.normal(next(k), (output_size, hidden_size)) * 0.1
        b_fc = jax.random.normal(next(k), (output_size,)) * 0.1
        o_pad = -(-output_size // 128) * 128
        self.o_pad = o_pad
        self.w_fc_pad = (jnp.zeros((hidden_size, o_pad), jnp.float32)
                         .at[:, :output_size].set(w_fc.T.astype(jnp.float32))
                         ).astype(jnp.bfloat16)
        self.b_fc_pad = (jnp.zeros((1, o_pad), jnp.float32)
                         .at[:, :output_size].set(b_fc.astype(jnp.float32)))

        self._forward_jit = jax.jit(self._forward)

    def _forward(self, x, hidden_state, cell_state):
        # Embedding gather in XLA glue (fused into the same jit program).
        emb = jnp.take(self.embedding, x, axis=0).astype(jnp.bfloat16)  # (N, E)

        N = emb.shape[0]
        L, _, H = hidden_state.shape
        kernel = functools.partial(_decoder_kernel, self.num_layers,
                                   self.hidden_size)

        in_arrays = [emb, hidden_state, cell_state,
                     *self.w_ih_t, *self.w_hh_t, *self.bias,
                     self.w_fc_pad, self.b_fc_pad]

        logits_pad, state_packed = pl.pallas_call(
            kernel,
            out_shape=(
                jax.ShapeDtypeStruct((N, self.o_pad), jnp.float32),
                jax.ShapeDtypeStruct((N, 2 * L * H), jnp.float32),
            ),
            in_specs=[_full_spec(a.shape) for a in in_arrays],
            out_specs=(
                _full_spec((N, self.o_pad)),
                _full_spec((N, 2 * L * H)),
            ),
            compiler_params=pltpu.CompilerParams(
                vmem_limit_bytes=32 * 1024 * 1024),
        )(*in_arrays)

        predictions = logits_pad[:, :self.output_size]       # drop lane padding
        # Unpack lane-dense state slab back into (L, N, H) h / c.
        hc = state_packed.reshape(N, 2, L, H)
        h_out = jnp.transpose(hc[:, 0], (1, 0, 2))
        c_out = jnp.transpose(hc[:, 1], (1, 0, 2))
        return predictions, h_out, c_out

    def __call__(self, x, hidden_state, cell_state):
        """
        x:            (N,) int32 token ids
        hidden_state: (num_layers, N, H) float32
        cell_state:   (num_layers, N, H) float32
        returns: predictions (N, output_size), hidden_state, cell_state
        """
        return self._forward_jit(x, hidden_state, cell_state)


# -----------------------------------------------------------------------------
# Pure-JAX reference (same parameterization / same bf16 matmul operands)
# for a correctness sanity check.
# -----------------------------------------------------------------------------
def _reference_forward(model, x, hidden_state, cell_state):
    emb = jnp.take(model.embedding, x, axis=0)
    H = model.hidden_size
    xin = emb
    new_h, new_c = [], []
    for l in range(model.num_layers):
        h = hidden_state[l]
        c = cell_state[l]
        gates = (jnp.dot(xin.astype(jnp.bfloat16), model.w_ih_t[l],
                         preferred_element_type=jnp.float32)
                 + jnp.dot(h.astype(jnp.bfloat16), model.w_hh_t[l],
                           preferred_element_type=jnp.float32)
                 + model.bias[l])
        i = jax.nn.sigmoid(gates[:, 0 * H:1 * H])
        f = jax.nn.sigmoid(gates[:, 1 * H:2 * H])
        o = jax.nn.sigmoid(gates[:, 2 * H:3 * H])
        g = jnp.tanh(gates[:, 3 * H:4 * H])
        c = f * c + i * g
        h = o * jnp.tanh(c)
        new_h.append(h)
        new_c.append(c)
        xin = h
    preds = (jnp.dot(xin.astype(jnp.bfloat16),
                     model.w_fc_pad[:, :model.output_size],
                     preferred_element_type=jnp.float32)
             + model.b_fc_pad[0, :model.output_size])
    return preds, jnp.stack(new_h, axis=0), jnp.stack(new_c, axis=0)


if __name__ == "__main__":
    # Small shapes consistent with the module.
    input_size = 50        # vocab
    embedding_size = 32
    hidden_size = 32
    num_layers = 2
    p = 0.1
    output_size = 16
    batch = 8

    key = jax.random.PRNGKey(0)
    k_model, k_x, k_h, k_c = jax.random.split(key, 4)

    model = DecoderLSTMPallas(input_size, embedding_size, hidden_size,
                              num_layers, p, output_size, k_model)

    x = jax.random.randint(k_x, (batch,), 0, input_size, dtype=jnp.int32)
    hidden_state = jax.random.normal(k_h, (num_layers, batch, hidden_size),
                                     jnp.float32)
    cell_state = jax.random.normal(k_c, (num_layers, batch, hidden_size),
                                   jnp.float32)

    preds, h_out, c_out = model(x, hidden_state, cell_state)
    jax.block_until_ready((preds, h_out, c_out))

    assert preds.shape == (batch, output_size)
    assert h_out.shape == (num_layers, batch, hidden_size)
    assert c_out.shape == (num_layers, batch, hidden_size)

    # Numerical sanity check against the pure-JAX reference.
    ref_preds, ref_h, ref_c = _reference_forward(model, x, hidden_state, cell_state)
    assert np.allclose(np.asarray(preds), np.asarray(ref_preds), rtol=1e-2, atol=1e-2)
    assert np.allclose(np.asarray(h_out), np.asarray(ref_h), rtol=1e-2, atol=1e-2)
    assert np.allclose(np.asarray(c_out), np.asarray(ref_c), rtol=1e-2, atol=1e-2)

    print("KERNEL_OK")
</pallas_src>

<mosaic_0001>
module attributes {stable_mosaic.version = 11 : i64} {
  func.func @_decoder_kernel(%arg0: memref<8x32xbf16, #tpu.memory_space<vmem>>, %arg1: memref<2x8x32xf32, #tpu.memory_space<vmem>>, %arg2: memref<2x8x32xf32, #tpu.memory_space<vmem>>, %arg3: memref<32x128xbf16, #tpu.memory_space<vmem>>, %arg4: memref<32x128xbf16, #tpu.memory_space<vmem>>, %arg5: memref<32x128xbf16, #tpu.memory_space<vmem>>, %arg6: memref<32x128xbf16, #tpu.memory_space<vmem>>, %arg7: memref<1x128xf32, #tpu.memory_space<vmem>>, %arg8: memref<1x128xf32, #tpu.memory_space<vmem>>, %arg9: memref<32x128xbf16, #tpu.memory_space<vmem>>, %arg10: memref<1x128xf32, #tpu.memory_space<vmem>>, %arg11: memref<8x128xf32, #tpu.memory_space<vmem>>, %arg12: memref<8x128xf32, #tpu.memory_space<vmem>>) attributes {dimension_semantics = [], scalar_prefetch = 0 : i64, scratch_operands = 0 : i64, tpu.core_type = #tpu.core_type<tc>} {
    %c0 = arith.constant 0 : index
    %c0_0 = arith.constant 0 : index
    %0 = vector.load %arg0[%c0, %c0_0] : memref<8x32xbf16, #tpu.memory_space<vmem>>, vector<8x32xbf16>
    %c0_1 = arith.constant 0 : index
    %c0_2 = arith.constant 0 : index
    %c0_3 = arith.constant 0 : index
    %1 = vector.load %arg1[%c0_1, %c0_2, %c0_3] : memref<2x8x32xf32, #tpu.memory_space<vmem>>, vector<1x8x32xf32>
    %2 = vector.shape_cast %1 : vector<1x8x32xf32> to vector<8x32xf32>
    %c0_4 = arith.constant 0 : index
    %c0_5 = arith.constant 0 : index
    %c0_6 = arith.constant 0 : index
    %3 = vector.load %arg2[%c0_4, %c0_5, %c0_6] : memref<2x8x32xf32, #tpu.memory_space<vmem>>, vector<1x8x32xf32>
    %4 = vector.shape_cast %3 : vector<1x8x32xf32> to vector<8x32xf32>
    %c0_7 = arith.constant 0 : index
    %c0_8 = arith.constant 0 : index
    %5 = vector.load %arg3[%c0_7, %c0_8] : memref<32x128xbf16, #tpu.memory_space<vmem>>, vector<32x128xbf16>
    %cst = arith.constant dense<0.000000e+00> : vector<8x128xf32>
    %6 = tpu.matmul %0, %5, %cst {dimension_numbers = #tpu.dot_dimension_numbers<[1], [0], [0], [1], [0, 0, 1, 1], [], []>} : vector<8x32xbf16>, vector<32x128xbf16>, vector<8x128xf32> -> vector<8x128xf32>
    %7 = arith.truncf %2 : vector<8x32xf32> to vector<8x32xbf16>
    %c0_9 = arith.constant 0 : index
    %c0_10 = arith.constant 0 : index
    %8 = vector.load %arg5[%c0_9, %c0_10] : memref<32x128xbf16, #tpu.memory_space<vmem>>, vector<32x128xbf16>
    %cst_11 = arith.constant dense<0.000000e+00> : vector<8x128xf32>
    %9 = tpu.matmul %7, %8, %cst_11 {dimension_numbers = #tpu.dot_dimension_numbers<[1], [0], [0], [1], [0, 0, 1, 1], [], []>} : vector<8x32xbf16>, vector<32x128xbf16>, vector<8x128xf32> -> vector<8x128xf32>
    %10 = arith.addf %6, %9 : vector<8x128xf32>
    %c0_12 = arith.constant 0 : index
    %c0_13 = arith.constant 0 : index
    %11 = vector.load %arg7[%c0_12, %c0_13] : memref<1x128xf32, #tpu.memory_space<vmem>>, vector<1x128xf32>
    %12 = vector.broadcast %11 : vector<1x128xf32> to vector<8x128xf32>
    %13 = arith.addf %10, %12 : vector<8x128xf32>
    %14 = vector.extract_strided_slice %13 {offsets = [0, 0], sizes = [8, 96], strides = [1, 1]} : vector<8x128xf32> to vector<8x96xf32>
    %15 = arith.negf %14 : vector<8x96xf32>
    %16 = math.exp %15 : vector<8x96xf32>
    %cst_14 = arith.constant 1.000000e+00 : f32
    %17 = vector.broadcast %cst_14 : f32 to vector<8x96xf32>
    %18 = arith.addf %17, %16 : vector<8x96xf32>
    %19 = arith.divf %17, %18 : vector<8x96xf32>
    %20 = vector.extract_strided_slice %13 {offsets = [0, 96], sizes = [8, 32], strides = [1, 1]} : vector<8x128xf32> to vector<8x32xf32>
    %21 = math.tanh %20 : vector<8x32xf32>
    %22 = vector.extract_strided_slice %19 {offsets = [0, 0], sizes = [8, 32], strides = [1, 1]} : vector<8x96xf32> to vector<8x32xf32>
    %23 = vector.extract_strided_slice %19 {offsets = [0, 32], sizes = [8, 32], strides = [1, 1]} : vector<8x96xf32> to vector<8x32xf32>
    %24 = vector.extract_strided_slice %19 {offsets = [0, 64], sizes = [8, 32], strides = [1, 1]} : vector<8x96xf32> to vector<8x32xf32>
    %25 = arith.mulf %23, %4 : vector<8x32xf32>
    %26 = arith.mulf %22, %21 : vector<8x32xf32>
    %27 = arith.addf %25, %26 : vector<8x32xf32>
    %28 = math.tanh %27 : vector<8x32xf32>
    %29 = arith.mulf %24, %28 : vector<8x32xf32>
    %c0_15 = arith.constant 0 : index
    %c0_16 = arith.constant 0 : index
    %30 = vector.load %arg12[%c0_15, %c0_16] : memref<8x128xf32, #tpu.memory_space<vmem>>, vector<8x32xf32>
    tpu.vector_store %arg12[%c0_15, %c0_16], %29 {strides = array<i32>} : memref<8x128xf32, #tpu.memory_space<vmem>>, vector<8x32xf32>,
    %c0_17 = arith.constant 0 : index
    %c64 = arith.constant 64 : index
    %31 = vector.load %arg12[%c0_17, %c64] : memref<8x128xf32, #tpu.memory_space<vmem>>, vector<8x32xf32>
    tpu.vector_store %arg12[%c0_17, %c64], %27 {strides = array<i32>} : memref<8x128xf32, #tpu.memory_space<vmem>>, vector<8x32xf32>,
    %c1 = arith.constant 1 : index
    %c0_18 = arith.constant 0 : index
    %c0_19 = arith.constant 0 : index
    %32 = vector.load %arg1[%c1, %c0_18, %c0_19] : memref<2x8x32xf32, #tpu.memory_space<vmem>>, vector<1x8x32xf32>
    %33 = vector.shape_cast %32 : vector<1x8x32xf32> to vector<8x32xf32>
    %c1_20 = arith.constant 1 : index
    %c0_21 = arith.constant 0 : index
    %c0_22 = arith.constant 0 : index
    %34 = vector.load %arg2[%c1_20, %c0_21, %c0_22] : memref<2x8x32xf32, #tpu.memory_space<vmem>>, vector<1x8x32xf32>
    %35 = vector.shape_cast %34 : vector<1x8x32xf32> to vector<8x32xf32>
    %36 = arith.truncf %29 : vector<8x32xf32> to vector<8x32xbf16>
    %c0_23 = arith.constant 0 : index
    %c0_24 = arith.constant 0 : index
    %37 = vector.load %arg4[%c0_23, %c0_24] : memref<32x128xbf16, #tpu.memory_space<vmem>>, vector<32x128xbf16>
    %cst_25 = arith.constant dense<0.000000e+00> : vector<8x128xf32>
    %38 = tpu.matmul %36, %37, %cst_25 {dimension_numbers = #tpu.dot_dimension_numbers<[1], [0], [0], [1], [0, 0, 1, 1], [], []>} : vector<8x32xbf16>, vector<32x128xbf16>, vector<8x128xf32> -> vector<8x128xf32>
    %39 = arith.truncf %33 : vector<8x32xf32> to vector<8x32xbf16>
    %c0_26 = arith.constant 0 : index
    %c0_27 = arith.constant 0 : index
    %40 = vector.load %arg6[%c0_26, %c0_27] : memref<32x128xbf16, #tpu.memory_space<vmem>>, vector<32x128xbf16>
    %cst_28 = arith.constant dense<0.000000e+00> : vector<8x128xf32>
    %41 = tpu.matmul %39, %40, %cst_28 {dimension_numbers = #tpu.dot_dimension_numbers<[1], [0], [0], [1], [0, 0, 1, 1], [], []>} : vector<8x32xbf16>, vector<32x128xbf16>, vector<8x128xf32> -> vector<8x128xf32>
    %42 = arith.addf %38, %41 : vector<8x128xf32>
    %c0_29 = arith.constant 0 : index
    %c0_30 = arith.constant 0 : index
    %43 = vector.load %arg8[%c0_29, %c0_30] : memref<1x128xf32, #tpu.memory_space<vmem>>, vector<1x128xf32>
    %44 = vector.broadcast %43 : vector<1x128xf32> to vector<8x128xf32>
    %45 = arith.addf %42, %44 : vector<8x128xf32>
    %46 = vector.extract_strided_slice %45 {offsets = [0, 0], sizes = [8, 96], strides = [1, 1]} : vector<8x128xf32> to vector<8x96xf32>
    %47 = arith.negf %46 : vector<8x96xf32>
    %48 = math.exp %47 : vector<8x96xf32>
    %cst_31 = arith.constant 1.000000e+00 : f32
    %49 = vector.broadcast %cst_31 : f32 to vector<8x96xf32>
    %50 = arith.addf %49, %48 : vector<8x96xf32>
    %51 = arith.divf %49, %50 : vector<8x96xf32>
    %52 = vector.extract_strided_slice %45 {offsets = [0, 96], sizes = [8, 32], strides = [1, 1]} : vector<8x128xf32> to vector<8x32xf32>
    %53 = math.tanh %52 : vector<8x32xf32>
    %54 = vector.extract_strided_slice %51 {offsets = [0, 0], sizes = [8, 32], strides = [1, 1]} : vector<8x96xf32> to vector<8x32xf32>
    %55 = vector.extract_strided_slice %51 {offsets = [0, 32], sizes = [8, 32], strides = [1, 1]} : vector<8x96xf32> to vector<8x32xf32>
    %56 = vector.extract_strided_slice %51 {offsets = [0, 64], sizes = [8, 32], strides = [1, 1]} : vector<8x96xf32> to vector<8x32xf32>
    %57 = arith.mulf %55, %35 : vector<8x32xf32>
    %58 = arith.mulf %54, %53 : vector<8x32xf32>
    %59 = arith.addf %57, %58 : vector<8x32xf32>
    %60 = math.tanh %59 : vector<8x32xf32>
    %61 = arith.mulf %56, %60 : vector<8x32xf32>
    %c0_32 = arith.constant 0 : index
    %c32 = arith.constant 32 : index
    %62 = vector.load %arg12[%c0_32, %c32] : memref<8x128xf32, #tpu.memory_space<vmem>>, vector<8x32xf32>
    tpu.vector_store %arg12[%c0_32, %c32], %61 {strides = array<i32>} : memref<8x128xf32, #tpu.memory_space<vmem>>, vector<8x32xf32>,
    %c0_33 = arith.constant 0 : index
    %c96 = arith.constant 96 : index
    %63 = vector.load %arg12[%c0_33, %c96] : memref<8x128xf32, #tpu.memory_space<vmem>>, vector<8x32xf32>
    tpu.vector_store %arg12[%c0_33, %c96], %59 {strides = array<i32>} : memref<8x128xf32, #tpu.memory_space<vmem>>, vector<8x32xf32>,
    %64 = arith.truncf %61 : vector<8x32xf32> to vector<8x32xbf16>
    %c0_34 = arith.constant 0 : index
    %c0_35 = arith.constant 0 : index
    %65 = vector.load %arg9[%c0_34, %c0_35] : memref<32x128xbf16, #tpu.memory_space<vmem>>, vector<32x128xbf16>
    %cst_36 = arith.constant dense<0.000000e+00> : vector<8x128xf32>
    %66 = tpu.matmul %64, %65, %cst_36 {dimension_numbers = #tpu.dot_dimension_numbers<[1], [0], [0], [1], [0, 0, 1, 1], [], []>} : vector<8x32xbf16>, vector<32x128xbf16>, vector<8x128xf32> -> vector<8x128xf32>
    %c0_37 = arith.constant 0 : index
    %c0_38 = arith.constant 0 : index
    %67 = vector.load %arg10[%c0_37, %c0_38] : memref<1x128xf32, #tpu.memory_space<vmem>>, vector<1x128xf32>
    %68 = vector.broadcast %67 : vector<1x128xf32> to vector<8x128xf32>
    %69 = arith.addf %66, %68 : vector<8x128xf32>
    %c0_39 = arith.constant 0 : index
    %c0_40 = arith.constant 0 : index
    %70 = vector.load %arg11[%c0_39, %c0_40] : memref<8x128xf32, #tpu.memory_space<vmem>>, vector<8x128xf32>
    tpu.vector_store %arg11[%c0_39, %c0_40], %69 {strides = array<i32>} : memref<8x128xf32, #tpu.memory_space<vmem>>, vector<8x128xf32>,
    return
  }
}

</mosaic_0001>

<bundles_post_ra>
// kernel: _forward.1
= control target key start
LH: loop header
LB: loop body
LE: loop exit
PB: predicated region body
PF: predicated region fallthrough
CT: control target
= control target key end

     0   :  { %18 = vsyncpa [#allocation3], 0  ;;  %s901_s0 = inlined_call_operand.vmem [shape: bf16[8,32], index: 0, kind: input, shape index: {}]   ;;  %s902_s1 = inlined_call_operand.vmem [shape: f32[2,8,32], index: 1, kind: input, shape index: {}]   ;;  %s903_s2 = inlined_call_operand.vmem [shape: f32[2,8,32], index: 2, kind: input, shape index: {}]   ;;  %s904_s3 = inlined_call_operand.hbm [shape: bf16[32,128], index: 3, kind: input, shape index: {}]   ;;  %s905_s4 = inlined_call_operand.hbm [shape: bf16[32,128], index: 4, kind: input, shape index: {}]   ;;  %s906_s5 = inlined_call_operand.vmem [shape: bf16[32,128], index: 5, kind: input, shape index: {}]   ;;  %s907_s6 = inlined_call_operand.vmem [shape: bf16[32,128], index: 6, kind: input, shape index: {}]   ;;  %s908_s7 = inlined_call_operand.vmem [shape: f32[1,128], index: 7, kind: input, shape index: {}]   ;;  %s909_s8 = inlined_call_operand.vmem [shape: f32[1,128], index: 8, kind: input, shape index: {}]   ;;  %s910_s9 = inlined_call_operand.vmem [shape: bf16[32,128], index: 9, kind: input, shape index: {}]   ;;  %s911_s10 = inlined_call_operand.vmem [shape: f32[1,128], index: 10, kind: input, shape index: {}]   ;;  %s912_s11 = inlined_call_operand.hbm [shape: f32[8,128], index: 11, kind: output, shape index: {0}]   ;;  %s913_s12 = inlined_call_operand.vmem [shape: f32[8,128], index: 12, kind: output, shape index: {1}]  }
   0x1   :  { %19 = vsyncpa [#allocation6], 0 }
   0x2   :  { %20 = vsyncpa [#allocation4], 0  ;;  %s690_s21 = smov [#allocation2]   ;;  %s618_s25 = scalar_lea.hbm %s904_s3, 256 }
   0x3   :  { %s32_s22 = sshll.u32 %s690_s21, 4  ;;  %p619_p0 = scmp.ne.s32.totalorder %s904_s3, %s618_s25  ;;  %s33_s22 = int_to_ptr.vmem [resolvable:$true] %s32_s22 }
   0x4   :  { %p622_p1 = scmp.lt.u32.totalorder %s618_s25, %s904_s3 }
   0x6   :  { %p624_p2 = pnand %p622_p1, %p619_p0 }
   0x8   :  { %627 = shalt.err (!%p624_p2)
}
   0x9   :  { %s628_s30 = scalar_lea.vmem %s33_s22, 256  ;;  %p633_p4 = scmp.lt.s32.totalorder %s33_s22, %s33_s22 }
   0xa   :  { %p629_p3 = scmp.ne.s32.totalorder %s33_s22, %s628_s30  ;;  %p634_p5 = scmp.lt.s32.totalorder %s628_s30, %s628_s30 }
   0xc   :  { %p635_p6 = por %p634_p5, %p633_p4 }
   0xe   :  { %p636_p7 = pnand %p635_p6, %p629_p3 }
  0x10   :  { %639 = shalt.err (!%p636_p7)
}
  0x11   :  { %s691_s13 = smov 64   ;;  %s692_s14 = smov 4  }
  0x12   :  { %38 = dma.hbm_to_vmem [thread:$0]  %s904_s3, 256, %s33_s22, [#allocation3], %s691_s13, %s691_s13, %s692_s14  }
  0x13   :  { %s693_s17 = smov [#allocation5]   ;;  %s640_s21 = scalar_lea.hbm %s905_s4, 256 }
  0x14   :  { %s44_s18 = sshll.u32 %s693_s17, 4  ;;  %p641_p8 = scmp.ne.s32.totalorder %s905_s4, %s640_s21  ;;  %s45_s18 = int_to_ptr.vmem [resolvable:$true] %s44_s18 }
  0x15   :  { %p644_p9 = scmp.lt.u32.totalorder %s640_s21, %s905_s4 }
  0x17   :  { %p646_p10 = pnand %p644_p9, %p641_p8 }
  0x19   :  { %649 = shalt.err (!%p646_p10)
}
  0x1a   :  { %s650_s27 = scalar_lea.vmem %s45_s18, 256  ;;  %p655_p12 = scmp.lt.s32.totalorder %s45_s18, %s45_s18 }
  0x1b   :  { %p651_p11 = scmp.ne.s32.totalorder %s45_s18, %s650_s27  ;;  %p656_p13 = scmp.lt.s32.totalorder %s650_s27, %s650_s27 }
  0x1d   :  { %p657_p0 = por %p656_p13, %p655_p12 }
  0x1f   :  { %p658_p1 = pnand %p657_p0, %p651_p11 }
  0x21   :  { %661 = shalt.err (!%p658_p1)
}
  0x22   :  { %50 = dma.hbm_to_vmem [thread:$0]  %s905_s4, 256, %s45_s18, [#allocation6], %s691_s13, %s691_s13, %s692_s14  }
  0x23   :  { %684 = dma.done.wait [#allocation3], 256  }
  0x24   :  { %685 = vsyncadd [#allocation3], 4294967040 }
  0x25   :  { %686 = dma.done.wait [#allocation6], 256  }
  0x26   :  { %687 = vsyncadd [#allocation6], 4294967040  ;;  %v694_v0 = vmov 0.0   ;;  %vm695_vm0 = vmmov 0   ;;  %v592_v1 = vld [vmem:[%s906_s5] sm:$0xff]   ;;  %v594_v3 = vld [vmem:[%s906_s5 + $0x8] sm:$0xff]  }
  0x27   :  { %543 = vmatprep.subr.bf16.mxu0 %v694_v0  ;;  %551 = vmatprep.subr.bf16.mxu1 %v694_v0  ;;  %v593_v2 = vld [vmem:[#allocation2] sm:$0xff]   ;;  %v595_v4 = vld [vmem:[#allocation2 + $0x8] sm:$0xff]   ;;  %vm94_vm1 = vcmask 261120   ;;  %s696_s18 = smov 32   ;;  %v597_v32 = vld [vmem:[#allocation5] sm:$0xff]   ;;  %s697_s29 = smov 96  }
  0x28   :  { %547 = vmatprep.mubr.msk.bf16.mxu0 %vm695_vm0, %v694_v0  ;;  %555 = vmatprep.mubr.msk.bf16.mxu1 %vm695_vm0, %v694_v0  ;;  %v71_v5 = vld [vmem:[%s902_s1] sm:$0xff]  ;;  %v598_v33 = vld [vmem:[%s907_s6 + $0x8] sm:$0xff]   ;;  %v599_v34 = vld [vmem:[#allocation5 + $0x8] sm:$0xff]   ;;  %vm238_vm2 = vcmask 785920   ;;  %vm407_vm3 = vcmask 523520   ;;  %vm413_vm4 = vcmask 1048320  }
  0x29   :  { %544 = vmatpush3.bf16.msra.mxu0 %v592_v1  ;;  %552 = vmatpush3.bf16.msra.mxu1 %v593_v2  ;;  %v77_v6 = vpack.c.bf16 %v71_v5, %v71_v5  ;;  %v70_v7 = vld [vmem:[%s901_s0] sm:$0xf]  ;;  %v514_v35 = vld [vmem:[%s902_s1 + $0x8] sm:$0xff] }
  0x2a   :  { %545 = vmatprep.subr.bf16.mxu0 %v694_v0  ;;  %553 = vmatprep.subr.bf16.mxu1 %v694_v0  ;;  %v512_v10 = vld [vmem:[%s908_s7] ss:$0 sm:$0xff]  ;;  %v249_v36 = vpack.c.bf16 %v514_v35, %v514_v35  ;;  %v515_v41 = vld [vmem:[%s903_s2 + $0x8] sm:$0xff] }
  0x2b   :  { %v72_v20 = vld [vmem:[%s903_s2] sm:$0xff] }
  0x2c   :  { %v596_v31 = vld [vmem:[%s907_s6] sm:$0xff]  }
  0x2d   :  { %546 = vmatpush3.bf16.msra.mxu0 %v594_v3  ;;  %554 = vmatpush3.bf16.msra.mxu1 %v595_v4  ;;  %v522_v48 = vld [vmem:[%s909_s8] ss:$0 sm:$0xff]  ;;  %v601_v4 = vld [vmem:[%s910_s9 + $0x8] sm:$0xff]  }
  0x2e   :  { %559 = vmatprep.subr.bf16.mxu0 %v694_v0  ;;  %567 = vmatprep.subr.bf16.mxu1 %v694_v0  ;;  %v600_v3 = vld [vmem:[%s910_s9] sm:$0xff]  }
  0x30   :  { %548 = vmatmul.mubr.msk.bf16.vlgmr.msra.gmra.mrb[0].mxu0 %vm94_vm1, %v77_v6  ;;  %556 = vmatmul.mubr.msk.bf16.vlgmr.msra.gmra.mrb[0].mxu1 %vm94_vm1, %v70_v7 }
  0x31   :  { %563 = vmatprep.mubr.msk.bf16.mxu0 %vm695_vm0, %v694_v0  ;;  %571 = vmatprep.mubr.msk.bf16.mxu1 %vm695_vm0, %v694_v0 }
  0x32   :  { %560 = vmatpush3.bf16.msra.mxu0 %v596_v31  ;;  %568 = vmatpush3.bf16.msra.mxu1 %v597_v32 }
  0x33   :  { %561 = vmatprep.subr.bf16.mxu0 %v694_v0  ;;  %569 = vmatprep.subr.bf16.mxu1 %v694_v0 }
  0x36   :  { %562 = vmatpush3.bf16.msra.mxu0 %v598_v33  ;;  %570 = vmatpush3.bf16.msra.mxu1 %v599_v34 }
  0x37   :  { %575 = vmatprep.subr.bf16.mxu0 %v694_v0 }
  0x39   :  { %564 = vmatmul.mubr.msk.bf16.vlgmr.msra.gmra.mrb[4].mxu0 %vm94_vm1, %v249_v36 }
  0x3a   :  { %579 = vmatprep.mubr.msk.bf16.mxu0 %vm695_vm0, %v694_v0  ;;  %576 = vmatpush3.bf16.msra.mxu0 %v600_v3 }
  0x3b   :  { %577 = vmatprep.subr.bf16.mxu0 %v694_v0 }
  0x3e   :  { %578 = vmatpush3.bf16.msra.mxu0 %v601_v4 }
 0x103   :  { %v132_v8 = vpop.f32.mrb[0].mxu0  ;;  %v187_v9 = vpop.f32.mrb[0].mxu1 }
 0x104   :  { %v549_v11 = vpop.f32.mrb[1].mxu0  ;;  %v188_v12 = vadd.f32 %v187_v9, %v132_v8  ;;  %v557_v13 = vpop.f32.mrb[1].mxu1 }
 0x105   :  { %v135_v14 = vpop.f32.mrb[2].mxu0  ;;  %v190_v15 = vpop.f32.mrb[2].mxu1 }
 0x106   :  { %v550_v16 = vpop.f32.mrb[3].mxu0  ;;  %v200_v17 = vadd.f32 %v512_v10, %v188_v12  ;;  %v558_v18 = vpop.f32.mrb[3].mxu1  ;;  %v524_v12 = vld [vmem:[%s911_s10] ss:$0 sm:$0xff] }
 0x108   :  { %602 = vtanh.f32 %v200_v17  ;;  %v513_v21 = vmul.f32 -1.442695, %v200_v17 }
 0x10a   :  { %604 = vpow2.f32 %v513_v21 }
 0x10c   :  { %v303_v42 = vpop.f32.mrb[4].mxu0 }
 0x10d   :  { %v565_v43 = vpop.f32.mrb[5].mxu0 }
 0x10e   :  { %v306_v44 = vpop.f32.mrb[6].mxu0 }
 0x10f   :  { %v566_v45 = vpop.f32.mrb[7].mxu0 }
 0x112   :  { %v603_v19 = vpop.eup %602 }
 0x113   :  { %214 = vrot.lane.b32.xlu0 %v603_v19, %s696_s18 }
 0x114   :  { %v605_v22 = vpop.eup %604 }
 0x115   :  { %v204_v23 = vadd.f32 1.0, %v605_v22 }
 0x117   :  { %209 = vrot.lane.b32.xlu0 %v72_v20, %s696_s18  ;;  %606 = vrcp.f32 %v204_v23 }
 0x121   :  { %v607_v24 = vpop.eup %606 }
 0x185   :  { %v215_v25 = vpop.permute.xlu0 %214 }
 0x186   :  { %v217_v26 = vmul.f32 %v607_v24, %v215_v25 }
 0x188   :  { %219 = vrot.lane.b32.xlu1 %v217_v26, %s696_s18 }
 0x189   :  { %v210_v27 = vpop.permute.xlu0 %209 }
 0x18a   :  { %v212_v28 = vmul.f32 %v607_v24, %v210_v27 }
 0x1fa   :  { %v220_v29 = vpop.permute.xlu1 %219 }
 0x1fb   :  { %v829_v30 = vadd.f32 %v220_v29, %v212_v28 }
 0x1fd   :  { %608 = vtanh.f32 %v829_v30 }
 0x207   :  { %v609_v37 = vpop.eup %608 }
 0x208   :  { %225 = vrot.lane.b32.xlu1 %v609_v37, %s696_s18 }
 0x27a   :  { %v226_v38 = vpop.permute.xlu1 %225 }
 0x27b   :  { %v228_v39 = vmul.f32 %v607_v24, %v226_v38 }
 0x27d   :  { %v244_v40 = vpack.c.bf16 %v228_v39, %v228_v39 }
 0x27f   :  { %310 = vrot.lane.b32.xlu0 %v244_v40, %s691_s13 }
 0x283   :  { %383 = vrot.lane.b32.xlu0 %v515_v41, %s696_s18 }
 0x2f1   :  { %v311_v46 = vpop.permute.xlu0 %310 }
 0x2f2   :  { %572 = vmatmul.mubr.msk.bf16.vlgmr.msra.gmra.mrb[4].mxu1 %vm94_vm1, %v311_v46 }
 0x2f5   :  { %v384_v61 = vpop.permute.xlu0 %383 }
 0x3c5   :  { %v361_v47 = vpop.f32.mrb[4].mxu1 }
 0x3c6   :  { %v362_v49 = vadd.f32 %v361_v47, %v303_v42  ;;  %v573_v50 = vpop.f32.mrb[5].mxu1 }
 0x3c7   :  { %v364_v51 = vpop.f32.mrb[6].mxu1 }
 0x3c8   :  { %v374_v52 = vadd.f32 %v522_v48, %v362_v49  ;;  %v574_v53 = vpop.f32.mrb[7].mxu1 }
 0x3ca   :  { %610 = vtanh.f32 %v374_v52  ;;  %v523_v55 = vmul.f32 -1.442695, %v374_v52 }
 0x3cc   :  { %612 = vpow2.f32 %v523_v55 }
 0x3d4   :  { %v611_v54 = vpop.eup %610 }
 0x3d5   :  { %388 = vrot.lane.b32.xlu1 %v611_v54, %s696_s18 }
 0x3d6   :  { %v613_v56 = vpop.eup %612 }
 0x3d7   :  { %v378_v57 = vadd.f32 1.0, %v613_v56 }
 0x3d9   :  { %614 = vrcp.f32 %v378_v57 }
 0x3e3   :  { %v615_v58 = vpop.eup %614 }
 0x3e4   :  { %v386_v62 = vmul.f32 %v615_v58, %v384_v61 }
 0x447   :  { %v389_v59 = vpop.permute.xlu1 %388 }
 0x448   :  { %v391_v60 = vmul.f32 %v615_v58, %v389_v59 }
 0x44a   :  { %393 = vrot.lane.b32.xlu1 %v391_v60, %s696_s18 }
 0x4bc   :  { %v394_v63 = vpop.permute.xlu1 %393 }
 0x4bd   :  { %v396_v1 = vadd.f32 %v394_v63, %v386_v62 }
 0x4bf   :  { %616 = vtanh.f32 %v396_v1 }
 0x4c9   :  { %v617_v2 = vpop.eup %616 }
 0x4ca   :  { %399 = vrot.lane.b32.xlu0 %v617_v2, %s696_s18 }
 0x4ce   :  { %230 = vrot.lane.b32.xlu0 %v228_v39, %s691_s13 }
 0x53c   :  { %v400_v5 = vpop.permute.xlu0 %399 }
 0x53d   :  { %v402_v6 = vmul.f32 %v615_v58, %v400_v5 }
 0x53f   :  { %404 = vrot.lane.b32.xlu0 %v402_v6, %s697_s29  ;;  %v415_v7 = vpack.c.bf16 %v402_v6, %v402_v6 }
 0x540   :  { %v231_v8 = vpop.permute.xlu0 %230 }
 0x541   :  { %233 = vst.msk [vmem:[%s913_s12] sm:$0xff] %vm94_vm1, %v231_v8  ;;  %428 = vrot.lane.b32.xlu1 %v415_v7, %s691_s13 }
 0x545   :  { %235 = vrot.lane.b32.xlu1 %v829_v30, %s696_s18  ;;  %s698_s18 = smov [#allocation7]  }
 0x546   :  { %s492_s19 = sshll.u32 %s698_s18, 4  ;;  %s493_s19 = int_to_ptr.vmem [resolvable:$true] %s492_s19 }
 0x547   :  { %s662_s20 = scalar_lea.vmem %s493_s19, 128  ;;  %p667_p3 = scmp.lt.s32.totalorder %s493_s19, %s493_s19 }
 0x548   :  { %p663_p2 = scmp.ne.s32.totalorder %s493_s19, %s662_s20  ;;  %p668_p4 = scmp.lt.s32.totalorder %s662_s20, %s662_s20 }
 0x549   :  { %410 = vrot.lane.b32.xlu1 %v396_v1, %s691_s13 }
 0x54a   :  { %p669_p5 = por %p668_p4, %p667_p3 }
 0x54c   :  { %p670_p6 = pnand %p669_p5, %p663_p2 }
 0x5b1   :  { %v405_v10 = vpop.permute.xlu0 %404 }
 0x5b3   :  { %v429_v0 = vpop.permute.xlu1 %428 }
 0x5b4   :  { %580 = vmatmul.mubr.msk.bf16.vlgmr.msra.gmra.mrb[8].mxu0 %vm94_vm1, %v429_v0 }
 0x5b7   :  { %v236_v9 = vpop.permute.xlu1 %235 }
 0x5b8   :  { %239 = vst.msk [vmem:[%s913_s12] sm:$0xff] %vm238_vm2, %v236_v9 }
 0x5b9   :  { %408 = vst.msk [vmem:[%s913_s12] sm:$0xff] %vm407_vm3, %v405_v10 }
 0x5bb   :  { %v411_v11 = vpop.permute.xlu1 %410 }
 0x5bc   :  { %414 = vst.msk [vmem:[%s913_s12] sm:$0xff] %vm413_vm4, %v411_v11 }
 0x687   :  { %v479_v13 = vpop.f32.mrb[8].mxu0 }
 0x688   :  { %v480_v14 = vadd.f32 %v524_v12, %v479_v13  ;;  %v581_v15 = vpop.f32.mrb[9].mxu0 }
 0x689   :  { %v482_v16 = vpop.f32.mrb[10].mxu0 }
 0x68a   :  { %485 = vst [vmem:[#allocation7] sm:$0xff] %v480_v14  ;;  %v582_v17 = vpop.f32.mrb[11].mxu0 }
 0x68b   :  { %673 = shalt.err (!%p670_p6)
}
 0x68c   :  { %s674_s10 = scalar_lea.hbm %s912_s11, 128 }
 0x68d   :  { %p675_p7 = scmp.ne.s32.totalorder %s912_s11, %s674_s10  ;;  %p678_p8 = scmp.lt.u32.totalorder %s674_s10, %s912_s11 }
 0x68f   :  { %p680_p9 = pnand %p678_p8, %p675_p7 }
 0x691   :  { %683 = shalt.err (!%p680_p9)
}
 0x692   :  { %495 = dma.vmem_to_hbm [thread:$0]  %s493_s19, 128, %s912_s11, [#allocation4]  }
 0x693   :  { %688 = dma.done.wait [#allocation4], 128  }
 0x694   :  { %689 = vsyncadd [#allocation4], 4294967168 }
 0x695   :  { %503 = vsyncpa [#allocation3], 1 }
 0x696   :  { %504 = vsyncpa [#allocation6], 1 }
 0x697   :  { %505 = vsyncpa [#allocation4], 1 }

</bundles_post_ra>
